<compile_context>
chip_gen: v6e
topology: v6e:2x2x1
jax: 0.10.0
libtpu: 0.0.40
codegen_flags: <defaults>
</compile_context>

<pallas_src>
import jax
import jax.numpy as jnp
from jax.experimental import pallas as pl
from jax.experimental.pallas import tpu as pltpu


def _ffn_kernel(x_ref, w1_ref, b1_ref, w2_ref, o_ref):
    # x_ref:  (TILE_M, d_in)        compute dtype (f32 or bf16)
    # w1_ref: (d_in, d_hid_p)       compute dtype
    # b1_ref: (1, d_hid_p)          f32
    # w2_ref: (d_hid_p, d_out_p)    compute dtype
    # o_ref:  (TILE_M, d_out_p)     output dtype (x.dtype)
    h = jnp.dot(x_ref[...], w1_ref[...], preferred_element_type=jnp.float32)
    h = jnp.maximum(h + b1_ref[...], 0.0)        # bias + ReLU in f32
    # dropout == identity (eval mode)
    y = jnp.dot(h.astype(w2_ref.dtype), w2_ref[...],
                preferred_element_type=jnp.float32)
    o_ref[...] = y.astype(o_ref.dtype)


def _round_up(x, m):
    return ((x + m - 1) // m) * m


def feed_forward_net(x, w1, b1, w2, *, tile_m=256, compute_dtype=None, lane=128):
    """x: (B, T, d_in).  w1: (d_hid, d_in, 1), b1: (d_hid,), w2: (d_out, d_hid, 1).

    compute_dtype: dtype of the MXU operands (e.g. jnp.bfloat16 on v6e/v7x);
                   accumulation is always f32.  Defaults to x.dtype.
    """
    B, T, d_in = x.shape
    d_hid = w1.shape[0]
    d_out = w2.shape[0]
    out_dtype = x.dtype
    if compute_dtype is None:
        compute_dtype = x.dtype

    # Pointwise-conv weights -> plain matmul weights, pre-transposed (channel-last).
    w1_t = jnp.transpose(w1[:, :, 0], (1, 0)).astype(compute_dtype)   # (d_in, d_hid)
    w2_t = jnp.transpose(w2[:, :, 0], (1, 0)).astype(compute_dtype)   # (d_hid, d_out)
    b1_2d = b1.reshape(1, d_hid).astype(jnp.float32)                  # (1, d_hid)

    # Pad hidden/output channel dims to the 128-lane width: lane-dense MXU shapes
    # and unmasked output stores.  Zero padding is exact: relu(0 + 0) = 0 and the
    # padded w2 columns are zero, so padded channels contribute nothing.
    d_hid_p = _round_up(d_hid, lane)
    d_out_p = _round_up(d_out, lane)
    w1_t = jnp.pad(w1_t, ((0, 0), (0, d_hid_p - d_hid)))
    b1_2d = jnp.pad(b1_2d, ((0, 0), (0, d_hid_p - d_hid)))
    w2_t = jnp.pad(w2_t, ((0, d_hid_p - d_hid), (0, d_out_p - d_out)))

    # Rows = flattened (B*T); pad to a multiple of tile_m instead of asserting.
    M = B * T
    tile_m = max(8, min(_round_up(tile_m, 8), _round_up(M, 8)))
    M_p = _round_up(M, tile_m)
    x2d = x.reshape(M, d_in).astype(compute_dtype)
    if M_p != M:
        x2d = jnp.pad(x2d, ((0, M_p - M), (0, 0)))

    grid = (M_p // tile_m,)

    # Explicit VMEM budget: double-buffered x/out row tiles + single-buffered
    # weights/bias + the f32 (tile_m, d_hid_p) hidden activation.
    cbytes = jnp.dtype(compute_dtype).itemsize
    obytes = jnp.dtype(out_dtype).itemsize
    est = (2 * tile_m * d_in * cbytes
           + 2 * tile_m * d_out_p * obytes
           + (d_in * d_hid_p + d_hid_p * d_out_p) * cbytes + d_hid_p * 4
           + tile_m * d_hid_p * 4)
    vmem_limit = min(max(int(1.25 * est) + (2 << 20), 32 << 20), 96 << 20)

    def _resident_spec(shape):
        # Constant index_map => the block never changes across the grid; request a
        # single buffer instead of the default double-buffer to save VMEM.
        return pl.BlockSpec(shape, lambda i: (0, 0), pipeline_mode=pl.Buffered(1))

    out2d = pl.pallas_call(
        _ffn_kernel,
        out_shape=jax.ShapeDtypeStruct((M_p, d_out_p), out_dtype),
        grid_spec=pltpu.PrefetchScalarGridSpec(
            num_scalar_prefetch=0,
            grid=grid,
            in_specs=[
                pl.BlockSpec((tile_m, d_in), lambda i: (i, 0)),
                _resident_spec((d_in, d_hid_p)),
                _resident_spec((1, d_hid_p)),
                _resident_spec((d_hid_p, d_out_p)),
            ],
            out_specs=pl.BlockSpec((tile_m, d_out_p), lambda i: (i, 0)),
        ),
        compiler_params=pltpu.CompilerParams(
            dimension_semantics=("parallel",),
            vmem_limit_bytes=vmem_limit),
    )(x2d, w1_t, b1_2d, w2_t)

    return out2d[:M, :d_out].reshape(B, T, d_out)


def feed_forward_net_ref(x, w1, b1, w2):
    """Pure-JAX reference mirroring the PyTorch module (eval mode)."""
    w1_t = jnp.transpose(w1[:, :, 0], (1, 0))
    w2_t = jnp.transpose(w2[:, :, 0], (1, 0))
    h = jnp.maximum(jnp.einsum("btc,ch->bth", x, w1_t) + b1, 0.0)
    return jnp.einsum("bth,ho->bto", h, w2_t)


if __name__ == "__main__":
    key = jax.random.PRNGKey(0)
    B, T = 2, 16
    d_in, d_hid, d_out = 32, 64, 32

    k_x, k_w1, k_b1, k_w2 = jax.random.split(key, 4)
    x = jax.random.normal(k_x, (B, T, d_in), dtype=jnp.float32)
    # Conv1d parameter shapes (kernel_size=1): weight (out_ch, in_ch, 1), bias (out_ch,)
    w1 = 0.1 * jax.random.normal(k_w1, (d_hid, d_in, 1), dtype=jnp.float32)
    b1 = 0.1 * jax.random.normal(k_b1, (d_hid,), dtype=jnp.float32)
    w2 = 0.1 * jax.random.normal(k_w2, (d_out, d_hid, 1), dtype=jnp.float32)

    ref = feed_forward_net_ref(x, w1, b1, w2)

    # f32 MXU-operand path: bit-accurate vs reference.
    out_f32 = jax.block_until_ready(
        feed_forward_net(x, w1, b1, w2, compute_dtype=jnp.float32))
    assert out_f32.shape == (B, T, d_out)
    assert jnp.allclose(out_f32, ref, atol=1e-5, rtol=1e-5), "f32 mismatch vs reference"

    # bf16 MXU-operand path (v6e/v7x fast path): f32 accumulation, looser tolerance
    # from bf16 rounding of x / weights / hidden activation.
    out_bf16 = jax.block_until_ready(
        feed_forward_net(x, w1, b1, w2, compute_dtype=jnp.bfloat16))
    assert out_bf16.shape == (B, T, d_out)
    assert jnp.allclose(out_bf16, ref, atol=5e-2, rtol=5e-2), "bf16 mismatch vs reference"

    print("KERNEL_OK")
</pallas_src>

<mosaic_0001>
module attributes {stable_mosaic.version = 11 : i64} {
  func.func @_ffn_kernel(%arg0: i32, %arg1: memref<32x32xf32, #tpu.memory_space<vmem>>, %arg2: memref<32x128xf32, #tpu.memory_space<vmem>>, %arg3: memref<1x128xf32, #tpu.memory_space<vmem>>, %arg4: memref<128x128xf32, #tpu.memory_space<vmem>>, %arg5: memref<32x128xf32, #tpu.memory_space<vmem>>) attributes {dimension_semantics = [#tpu.dimension_semantics<parallel>], iteration_bounds = array<i64: 1>, scalar_prefetch = 0 : i64, scratch_operands = 0 : i64, tpu.core_type = #tpu.core_type<tc>, window_params = [{transform_indices = @transform_0, window_bounds = array<i64: 32, 32>}, {pipeline_mode = #tpu.pipeline_mode<synchronous>, transform_indices = @transform_1, window_bounds = array<i64: 32, 128>}, {pipeline_mode = #tpu.pipeline_mode<synchronous>, transform_indices = @transform_2, window_bounds = array<i64: 1, 128>}, {pipeline_mode = #tpu.pipeline_mode<synchronous>, transform_indices = @transform_3, window_bounds = array<i64: 128, 128>}, {transform_indices = @transform_4, window_bounds = array<i64: 32, 128>}]} {
    %c0 = arith.constant 0 : index
    %c0_0 = arith.constant 0 : index
    %0 = vector.load %arg1[%c0, %c0_0] : memref<32x32xf32, #tpu.memory_space<vmem>>, vector<32x32xf32>
    %c0_1 = arith.constant 0 : index
    %c0_2 = arith.constant 0 : index
    %1 = vector.load %arg2[%c0_1, %c0_2] : memref<32x128xf32, #tpu.memory_space<vmem>>, vector<32x128xf32>
    %cst = arith.constant dense<0.000000e+00> : vector<32x128xf32>
    %2 = tpu.matmul %0, %1, %cst {dimension_numbers = #tpu.dot_dimension_numbers<[1], [0], [0], [1], [0, 0, 1, 1], [], []>} : vector<32x32xf32>, vector<32x128xf32>, vector<32x128xf32> -> vector<32x128xf32>
    %c0_3 = arith.constant 0 : index
    %c0_4 = arith.constant 0 : index
    %3 = vector.load %arg3[%c0_3, %c0_4] : memref<1x128xf32, #tpu.memory_space<vmem>>, vector<1x128xf32>
    %4 = vector.broadcast %3 : vector<1x128xf32> to vector<32x128xf32>
    %5 = arith.addf %2, %4 : vector<32x128xf32>
    %cst_5 = arith.constant 0.000000e+00 : f32
    %6 = vector.broadcast %cst_5 : f32 to vector<32x128xf32>
    %7 = arith.maximumf %5, %6 : vector<32x128xf32>
    %c0_6 = arith.constant 0 : index
    %c0_7 = arith.constant 0 : index
    %8 = vector.load %arg4[%c0_6, %c0_7] : memref<128x128xf32, #tpu.memory_space<vmem>>, vector<128x128xf32>
    %cst_8 = arith.constant dense<0.000000e+00> : vector<32x128xf32>
    %9 = tpu.matmul %7, %8, %cst_8 {dimension_numbers = #tpu.dot_dimension_numbers<[1], [0], [0], [1], [0, 0, 1, 1], [], []>} : vector<32x128xf32>, vector<128x128xf32>, vector<32x128xf32> -> vector<32x128xf32>
    %c0_9 = arith.constant 0 : index
    %c0_10 = arith.constant 0 : index
    %10 = vector.load %arg5[%c0_9, %c0_10] : memref<32x128xf32, #tpu.memory_space<vmem>>, vector<32x128xf32>
    tpu.vector_store %arg5[%c0_9, %c0_10], %9 {strides = array<i32>} : memref<32x128xf32, #tpu.memory_space<vmem>>, vector<32x128xf32>,
    return
  }
  func.func @transform_0(%arg0: i32) -> (i32, i32) {
    %c0_i32 = arith.constant 0 : i32
    %c0_i32_0 = arith.constant 0 : i32
    return %arg0, %c0_i32 : i32, i32
  }
  func.func @transform_1(%arg0: i32) -> (i32, i32) {
    %c0_i32 = arith.constant 0 : i32
    %c0_i32_0 = arith.constant 0 : i32
    %c0_i32_1 = arith.constant 0 : i32
    return %c0_i32, %c0_i32_0 : i32, i32
  }
  func.func @transform_2(%arg0: i32) -> (i32, i32) {
    %c0_i32 = arith.constant 0 : i32
    %c0_i32_0 = arith.constant 0 : i32
    %c0_i32_1 = arith.constant 0 : i32
    return %c0_i32, %c0_i32_0 : i32, i32
  }
  func.func @transform_3(%arg0: i32) -> (i32, i32) {
    %c0_i32 = arith.constant 0 : i32
    %c0_i32_0 = arith.constant 0 : i32
    %c0_i32_1 = arith.constant 0 : i32
    return %c0_i32, %c0_i32_0 : i32, i32
  }
  func.func @transform_4(%arg0: i32) -> (i32, i32) {
    %c0_i32 = arith.constant 0 : i32
    %c0_i32_0 = arith.constant 0 : i32
    return %arg0, %c0_i32 : i32, i32
  }
}

</mosaic_0001>

<bundles_post_ra>
// kernel: tpu_custom_call.1
= control target key start
LH: loop header
LB: loop body
LE: loop exit
PB: predicated region body
PF: predicated region fallthrough
CT: control target
= control target key end

     0   :  { %9 = vsyncpa [#allocation3], 0  ;;  %s538_s0 = inlined_call_operand.hbm [shape: f32[32,32], index: 0, kind: input, shape index: {}]   ;;  %s539_s1 = inlined_call_operand.hbm [shape: f32[32,128], index: 1, kind: input, shape index: {}]   ;;  %s540_s2 = inlined_call_operand.vmem [shape: f32[1,128], index: 2, kind: input, shape index: {}]   ;;  %s541_s3 = inlined_call_operand.hbm [shape: f32[128,128], index: 3, kind: input, shape index: {}]   ;;  %s542_s4 = inlined_call_operand.hbm [shape: f32[32,128], index: 4, kind: output, shape index: {}]  }
   0x1   :  { %10 = vsyncpa [#allocation6], 0 }
   0x2   :  { %11 = vsyncpa [#allocation4], 0  ;;  %s476_s15 = smov [#allocation5]   ;;  %s477_s17 = smov [#allocation2]  }
   0x3   :  { %s29_s16 = sshll.u32 %s476_s15, 4  ;;  %s17_s18 = sshll.u32 %s477_s17, 4  ;;  %s30_s16 = int_to_ptr.vmem [resolvable:$true] %s29_s16  ;;  %s18_s18 = int_to_ptr.vmem [resolvable:$true] %s17_s18 }
   0x4   :  { %s398_s19 = scalar_lea.vmem %s30_s16, 512  ;;  %p403_p1 = scmp.lt.s32.totalorder %s30_s16, %s30_s16 }
   0x5   :  { %p399_p0 = scmp.ne.s32.totalorder %s30_s16, %s398_s19  ;;  %p404_p2 = scmp.lt.s32.totalorder %s398_s19, %s398_s19 }
   0x7   :  { %p405_p3 = por %p404_p2, %p403_p1 }
   0x9   :  { %p406_p4 = pnand %p405_p3, %p399_p0 }
   0xb   :  { %409 = shalt.err (!%p406_p4)
}
   0xc   :  { %s478_s20 = smov 128   ;;  %s479_s21 = smov 8  }
   0xd   :  { %35 = dma.hbm_to_vmem [thread:$0]  %s539_s1, 512, %s30_s16, [#allocation6], %s478_s20, %s478_s20, %s479_s21  }
   0xe   :  { %s418_s24 = scalar_lea.vmem %s18_s18, 512  ;;  %p423_p6 = scmp.lt.s32.totalorder %s18_s18, %s18_s18 }
   0xf   :  { %p419_p5 = scmp.ne.s32.totalorder %s18_s18, %s418_s24  ;;  %p424_p7 = scmp.lt.s32.totalorder %s418_s24, %s418_s24 }
  0x11   :  { %p425_p8 = por %p424_p7, %p423_p6 }
  0x13   :  { %p426_p9 = pnand %p425_p8, %p419_p5 }
  0x15   :  { %429 = shalt.err (!%p426_p9)
}
  0x16   :  { %23 = dma.hbm_to_vmem [thread:$0]  %s538_s0, 512, %s18_s18, [#allocation3], %s478_s20, %s478_s20, %s479_s21  }
  0x17   :  { %s480_s27 = smov [#allocation7]  }
  0x18   :  { %s43_s28 = sshll.u32 %s480_s27, 4  ;;  %s44_s28 = int_to_ptr.vmem [resolvable:$true] %s43_s28 }
  0x19   :  { %s438_s29 = scalar_lea.vmem %s44_s28, 2048  ;;  %p443_p11 = scmp.lt.s32.totalorder %s44_s28, %s44_s28 }
  0x1a   :  { %p439_p10 = scmp.ne.s32.totalorder %s44_s28, %s438_s29  ;;  %p444_p12 = scmp.lt.s32.totalorder %s438_s29, %s438_s29 }
  0x1c   :  { %p445_p13 = por %p444_p12, %p443_p11 }
  0x1e   :  { %p446_p0 = pnand %p445_p13, %p439_p10 }
  0x20   :  { %449 = shalt.err (!%p446_p0)
}
  0x21   :  { %49 = dma.hbm_to_vmem [thread:$0]  %s541_s3, 2048, %s44_s28, [#allocation6], %s478_s20, %s478_s20, %s479_s21  }
  0x22   :  { %470 = dma.done.wait [#allocation3], 512  }
  0x23   :  { %471 = vsyncadd [#allocation3], 4294966784 }
  0x24   :  { %472 = dma.done.wait [#allocation6], 2560  }
  0x25   :  { %473 = vsyncadd [#allocation6], 4294964736  ;;  %vm74_vm0 = vcmask 261120   ;;  %v66_v0 = vld [vmem:[#allocation5 + $0x18] sm:$0xff]  ;;  %v65_v1 = vld [vmem:[#allocation5 + $0x10] sm:$0xff] }
  0x26   :  { %332 = vmatprep.subr.mxu0 %v66_v0  ;;  %v59_v2 = vld [vmem:[#allocation2] sm:$0xff]  ;;  %v64_v3 = vld [vmem:[#allocation5 + $0x8] sm:$0xff]  ;;  %v191_v4 = vld [vmem:[#allocation7 + $0x78] sm:$0xff] }
  0x27   :  { %333 = vmatpush3.msra.mxu0 %v66_v0  ;;  %340 = vmatprep.mubr.msk.f32.mxu0 %vm74_vm0, %v59_v2  ;;  %v190_v5 = vld [vmem:[#allocation7 + $0x70] sm:$0xff]  ;;  %v63_v6 = vld [vmem:[#allocation5] sm:$0xff]  ;;  %v189_v7 = vld [vmem:[#allocation7 + $0x68] sm:$0xff] }
  0x28   :  { %334 = vmatprep.subr.mxu0 %v65_v1  ;;  %346 = vmatprep.subr.mxu1 %v191_v4  ;;  %v60_v8 = vld [vmem:[#allocation2 + $0x8] sm:$0xff]  ;;  %v188_v9 = vld [vmem:[#allocation7 + $0x60] sm:$0xff]  ;;  %v61_v10 = vld [vmem:[#allocation2 + $0x10] sm:$0xff] }
  0x29   :  { %335 = vmatpush3.msra.mxu0 %v65_v1  ;;  %347 = vmatpush3.msra.mxu1 %v191_v4  ;;  %v187_v11 = vld [vmem:[#allocation7 + $0x58] sm:$0xff]  ;;  %v186_v13 = vld [vmem:[#allocation7 + $0x50] sm:$0xff]  ;;  %v185_v14 = vld [vmem:[#allocation7 + $0x48] sm:$0xff] }
  0x2a   :  { %336 = vmatprep.subr.mxu0 %v64_v3  ;;  %348 = vmatprep.subr.mxu1 %v190_v5  ;;  %v62_v12 = vld [vmem:[#allocation2 + $0x18] sm:$0xff]  ;;  %v184_v15 = vld [vmem:[#allocation7 + $0x40] sm:$0xff]  ;;  %v182_v17 = vld [vmem:[#allocation7 + $0x30] sm:$0xff] }
  0x2b   :  { %337 = vmatpush3.msra.mxu0 %v64_v3  ;;  %349 = vmatpush3.msra.mxu1 %v190_v5  ;;  %v183_v16 = vld [vmem:[#allocation7 + $0x38] sm:$0xff]  ;;  %v181_v18 = vld [vmem:[#allocation7 + $0x28] sm:$0xff]  ;;  %v180_v19 = vld [vmem:[#allocation7 + $0x20] sm:$0xff] }
  0x2c   :  { %338 = vmatprep.subr.mxu0 %v63_v6  ;;  %350 = vmatprep.subr.mxu1 %v189_v7  ;;  %v179_v20 = vld [vmem:[#allocation7 + $0x18] sm:$0xff]  ;;  %v178_v21 = vld [vmem:[#allocation7 + $0x10] sm:$0xff]  ;;  %v177_v22 = vld [vmem:[#allocation7 + $0x8] sm:$0xff] }
  0x2d   :  { %339 = vmatpush3.msra.mxu0 %v63_v6  ;;  %351 = vmatpush3.msra.mxu1 %v189_v7  ;;  %v176_v23 = vld [vmem:[#allocation7] sm:$0xff] }
  0x2e   :  { %341 = vmatmul.mubr.msk.f32.vlgmr.msra.gmra.mxu0 %vm74_vm0, %v60_v8  ;;  %352 = vmatprep.subr.mxu1 %v188_v9  ;;  %v299_v24 = vld [vmem:[%s540_s2] ss:$0 sm:$0xff]  ;;  %s481_s2 = smov [#allocation8]  }
  0x2f   :  { %343 = vmatprep.mubr.msk.f32.mxu0 %vm74_vm0, %v61_v10  ;;  %353 = vmatpush3.msra.mxu1 %v188_v9  ;;  %s286_s5 = sshll.u32 %s481_s2, 4  ;;  %s287_s5 = int_to_ptr.vmem [resolvable:$true] %s286_s5 }
  0x30   :  { %354 = vmatprep.subr.mxu1 %v187_v11  ;;  %s450_s6 = scalar_lea.vmem %s287_s5, 512  ;;  %p455_p2 = scmp.lt.s32.totalorder %s287_s5, %s287_s5 }
  0x31   :  { %355 = vmatpush3.msra.mxu1 %v187_v11  ;;  %p451_p1 = scmp.ne.s32.totalorder %s287_s5, %s450_s6  ;;  %p456_p3 = scmp.lt.s32.totalorder %s450_s6, %s450_s6 }
  0x32   :  { %344 = vmatmul.mubr.msk.f32.gmra.mxu0 %vm74_vm0, %v62_v12  ;;  %356 = vmatprep.subr.mxu1 %v186_v13 }
  0x33   :  { %357 = vmatpush3.msra.mxu1 %v186_v13  ;;  %p457_p4 = por %p456_p3, %p455_p2 }
  0x34   :  { %358 = vmatprep.subr.mxu1 %v185_v14 }
  0x35   :  { %359 = vmatpush3.msra.mxu1 %v185_v14  ;;  %p458_p5 = pnand %p457_p4, %p451_p1 }
  0x36   :  { %360 = vmatprep.subr.mxu1 %v184_v15 }
  0x37   :  { %361 = vmatpush3.msra.mxu1 %v184_v15 }
  0x38   :  { %362 = vmatprep.subr.mxu1 %v183_v16 }
  0x39   :  { %363 = vmatpush3.msra.mxu1 %v183_v16 }
  0x3a   :  { %364 = vmatprep.subr.mxu1 %v182_v17 }
  0x3b   :  { %365 = vmatpush3.msra.mxu1 %v182_v17 }
  0x3c   :  { %366 = vmatprep.subr.mxu1 %v181_v18 }
  0x3d   :  { %367 = vmatpush3.msra.mxu1 %v181_v18 }
  0x3e   :  { %368 = vmatprep.subr.mxu1 %v180_v19 }
  0x3f   :  { %369 = vmatpush3.msra.mxu1 %v180_v19 }
  0x40   :  { %370 = vmatprep.subr.mxu1 %v179_v20 }
  0x41   :  { %371 = vmatpush3.msra.mxu1 %v179_v20 }
  0x42   :  { %372 = vmatprep.subr.mxu1 %v178_v21 }
  0x43   :  { %373 = vmatpush3.msra.mxu1 %v178_v21 }
  0x44   :  { %374 = vmatprep.subr.mxu1 %v177_v22 }
  0x45   :  { %375 = vmatpush3.msra.mxu1 %v177_v22 }
  0x46   :  { %376 = vmatprep.subr.mxu1 %v176_v23 }
  0x47   :  { %377 = vmatpush3.msra.mxu1 %v176_v23 }
  0xee   :  { %v342_v25 = vpop.f32.mrf.mxu0 }
  0xef   :  { %v159_v26 = vadd.f32 %v342_v25, %v299_v24 }
  0xf0   :  { %v153_v27 = vpop.f32.mrf.mxu0 }
  0xf1   :  { %v154_v28 = vadd.f32 %v299_v24, %v153_v27  ;;  %v173_v31 = vmax.f32 %v159_v26, 0.0 }
  0xf2   :  { %v345_v29 = vpop.f32.mrf.mxu0 }
  0xf3   :  { %v172_v30 = vmax.f32 %v154_v28, 0.0  ;;  %v169_v32 = vadd.f32 %v345_v29, %v299_v24 }
  0xf4   :  { %v163_v33 = vpop.f32.mrf.mxu0 }
  0xf5   :  { %v164_v34 = vadd.f32 %v299_v24, %v163_v33  ;;  %378 = vmatprep.mubr.f32.mxu1 %v172_v30  ;;  %v175_v36 = vmax.f32 %v169_v32, 0.0 }
  0xf6   :  { %379 = vmatmul.mubr.f32.vlgmr.msra.gmra.mxu1 %v173_v31 }
  0xf7   :  { %v174_v35 = vmax.f32 %v164_v34, 0.0 }
  0xf9   :  { %381 = vmatprep.mubr.f32.mxu1 %v174_v35 }
  0xfa   :  { %382 = vmatmul.mubr.f32.gmra.mxu1 %v175_v36 }
 0x1b6   :  { %v380_v37 = vpop.f32.mrf.mxu1 }
 0x1b7   :  { %278 = vst [vmem:[#allocation8 + $0x8] sm:$0xff] %v380_v37 }
 0x1b8   :  { %v258_v38 = vpop.f32.mrf.mxu1 }
 0x1b9   :  { %277 = vst [vmem:[#allocation8] sm:$0xff] %v258_v38 }
 0x1ba   :  { %v383_v39 = vpop.f32.mrf.mxu1 }
 0x1bb   :  { %280 = vst [vmem:[#allocation8 + $0x18] sm:$0xff] %v383_v39 }
 0x1bc   :  { %v268_v40 = vpop.f32.mrf.mxu1 }
 0x1bd   :  { %279 = vst [vmem:[#allocation8 + $0x10] sm:$0xff] %v268_v40 }
 0x1be   :  { %461 = shalt.err (!%p458_p5)
}
 0x1bf   :  { %292 = dma.vmem_to_hbm [thread:$0]  %s287_s5, 512, %s542_s4, [#allocation4], %s478_s20, %s478_s20, %s479_s21  }
 0x1c0   :  { %474 = dma.done.wait [#allocation4], 512  }
 0x1c1   :  { %475 = vsyncadd [#allocation4], 4294966784 }
 0x1c2   :  { %296 = vsyncpa [#allocation3], 1 }
 0x1c3   :  { %297 = vsyncpa [#allocation6], 1 }
 0x1c4   :  { %298 = vsyncpa [#allocation4], 1 }

</bundles_post_ra>
